<compile_context>
chip_gen: v7x
topology: tpu7x:2x2x1
jax: 0.10.0
libtpu: 0.0.40
codegen_flags: <defaults>
</compile_context>

<pallas_src>
import math

import jax
import jax.numpy as jnp
from jax.experimental import pallas as pl
from jax.experimental.pallas import tpu as pltpu


# ---------------------------------------------------------------------------
# PE table construction (the module's registered buffer; built once, plain JAX).
# ---------------------------------------------------------------------------
def make_positional_encoding_table(d_model: int, max_len: int = 5000) -> jnp.ndarray:
    """pe buffer with shape (max_len, 1, d_model), same as the PyTorch module."""
    position = jnp.arange(0, max_len, dtype=jnp.float32)[:, None]            # (max_len, 1)
    div_term = jnp.exp(
        jnp.arange(0, d_model, 2, dtype=jnp.float32) * (-math.log(10000.0) / d_model)
    )                                                                         # (ceil(D/2),)
    angles = position * div_term                                              # (max_len, ceil(D/2))
    pe = jnp.zeros((max_len, d_model), dtype=jnp.float32)
    pe = pe.at[:, 0::2].set(jnp.sin(angles))
    pe = pe.at[:, 1::2].set(jnp.cos(angles)[:, : d_model // 2])
    return pe[:, None, :]                                                     # (max_len, 1, D)


# ---------------------------------------------------------------------------
# Kernels
# ---------------------------------------------------------------------------
def _pe_add_bcast_kernel(x_ref, pe_ref, o_ref):
    # x_ref: (s_tile, B, D); pe_ref: (s_tile, 1, D) float32.
    # Add in f32 (matches PyTorch's bf16 + f32-pe promotion), broadcast over the
    # batch (sublane) axis in-kernel, round once on the store.
    o_ref[...] = (x_ref[...].astype(jnp.float32) + pe_ref[...]).astype(o_ref.dtype)


def _make_pe_add_flat_kernel(batch: int, d_model: int):
    # x_ref / o_ref: (s_tile, B*D) lane-dense; pe_ref: (s_tile, D) float32.
    # pe is replicated over the batch *inside* the kernel via a static unrolled
    # loop over D-wide lane slices — no (S, B, D) pe broadcast ever hits HBM.
    def kernel(x_ref, pe_ref, o_ref):
        pe = pe_ref[...]                                   # load once per block
        for b in range(batch):
            lo = b * d_model
            xb = x_ref[:, lo:lo + d_model].astype(jnp.float32)
            o_ref[:, lo:lo + d_model] = (xb + pe).astype(o_ref.dtype)
    return kernel


# ---------------------------------------------------------------------------
# Tiling / VMEM policy
# ---------------------------------------------------------------------------
# Cap on the static batch unroll in the flattened kernel; beyond this the batch
# axis already fills sublanes well, so the (s_tile, B, D) path is used instead.
_FLAT_B_UNROLL_CAP = 32


def _cdiv(a, b):
    return -(-a // b)


def _round_down(x, m):
    return (x // m) * m


def _round_up(x, m):
    return _cdiv(x, m) * m


def _vmem_budget_bytes():
    """(block-data budget, explicit scoped-VMEM limit) per TPU generation."""
    kind = ""
    try:
        kind = jax.devices()[0].device_kind.lower()
    except Exception:
        pass
    if "v7" in kind or "7x" in kind:
        # 64 MiB physical per TensorCore; both cores allocate their own buffers.
        return 20 << 20, 48 << 20
    if "v6" in kind:
        # 128 MiB physical, 32 MiB scoped default -> raise explicitly.
        return 28 << 20, 64 << 20
    # v5e / unknown / interpret: conservative (v5e scoped default is 16 MiB).
    return 10 << 20, 28 << 20


def _pick_s_tile(S, bytes_per_row, budget_bytes, sublane, *, need_mult8, min_steps=2):
    """Rows of the sequence axis per grid step.

    * Double-buffered block data for all operands fits `budget_bytes`.
    * Aligned to the dtype's packed sublane multiple (8/16/32) when possible;
      always a multiple of 8 when `need_mult8` (2-D BlockSpec sublane rule).
    * At least `min_steps` grid steps when S allows it, so the "parallel" grid
      axis can actually be sharded across both v7x TensorCores.
    """
    max_rows = max(1, budget_bytes // (2 * max(1, bytes_per_row)))   # x2 = double buffer
    # Prefer the dtype's packed sublane multiple; fall back to the hard 8-row
    # rule when S or the budget is too small for a full packed group.
    align = sublane if (S >= sublane and max_rows >= sublane) else 8

    if S < align:
        return 8 if (need_mult8 and S >= 8) else S

    cand = min(max_rows, S)
    if min_steps > 1 and S >= min_steps * align:
        cand = min(cand, _cdiv(S, min_steps))
    # Floor at one aligned group even for a pathologically small budget; the
    # explicit vmem_limit_bytes keeps >2x headroom over `budget_bytes`.
    cand = max(align, _round_down(cand, align))

    # Balance tiles across the implied step count (avoid a tiny ragged last tile).
    n_steps = _cdiv(S, cand)
    cand = min(cand, _round_up(_cdiv(S, n_steps), align))
    return cand


# ---------------------------------------------------------------------------
# Forward
# ---------------------------------------------------------------------------
def positional_encoding_forward(
    x: jnp.ndarray,
    pe: jnp.ndarray,
    *,
    block_budget_bytes: int | None = None,
    vmem_limit_bytes: int | None = None,
) -> jnp.ndarray:
    """x: (S, B, D), pe: (max_len, 1, D) float32.  Returns x + pe[:S].

    Eval-mode dropout = identity.  Output dtype matches x (the add is performed
    in float32 in-kernel and rounded once on the store, so low-precision inputs
    keep PyTorch's f32-accumulate behaviour up to the final rounding).
    """
    S, B, D = x.shape
    max_len = pe.shape[0]
    if pe.shape != (max_len, 1, D):
        raise ValueError(f"pe shape {pe.shape} does not match (max_len, 1, {D})")
    if S > max_len:
        raise ValueError(f"seq_len {S} exceeds max_len {max_len}")

    itemsize = jnp.dtype(x.dtype).itemsize
    sublane = max(8, 32 // itemsize)            # packed sublane rows: 8 f32 / 16 bf16 / 32 int8

    default_budget, default_limit = _vmem_budget_bytes()
    budget = block_budget_bytes if block_budget_bytes is not None else default_budget
    limit = vmem_limit_bytes if vmem_limit_bytes is not None else default_limit

    compiler_params = pltpu.CompilerParams(
        dimension_semantics=("parallel",),      # sequence tiles are independent
        vmem_limit_bytes=limit,
    )
    cost = pl.CostEstimate(
        flops=S * B * D,
        transcendentals=0,
        bytes_accessed=2 * S * B * D * itemsize + S * D * 4,   # x + out + pe(f32)
    )

    # x + out + pe bytes per sequence row (pe stays float32, read once per row).
    bytes_per_row = 2 * B * D * itemsize + D * 4

    # Flattened lane-dense path for small batches (sublane underfill in the 3-D
    # layout) and for D not a multiple of 128.  Falls back to 3-D blocks for
    # tiny S or large batch unrolls (where sublanes are already well filled).
    use_flat = (
        S >= 8
        and B <= _FLAT_B_UNROLL_CAP
        and not (D % 128 == 0 and B >= sublane)
    )

    if not use_flat:
        # (s_tile, B, D) blocks; pe broadcasts over the batch (sublane) axis.
        s_tile = _pick_s_tile(S, bytes_per_row, budget, sublane,
                              need_mult8=False, min_steps=2)
        grid = (pl.cdiv(S, s_tile),)
        return pl.pallas_call(
            _pe_add_bcast_kernel,
            out_shape=jax.ShapeDtypeStruct((S, B, D), x.dtype),
            grid=grid,
            in_specs=[
                pl.BlockSpec((s_tile, B, D), lambda i: (i, 0, 0)),
                pl.BlockSpec((s_tile, 1, D), lambda i: (i, 0, 0)),   # slices pe[:S]
            ],
            out_specs=pl.BlockSpec((s_tile, B, D), lambda i: (i, 0, 0)),
            compiler_params=compiler_params,
            cost_estimate=cost,
        )(x, pe)

    # Lane-dense flattened path: x viewed as (S, B*D) (bitcast reshape, no copy),
    # pe viewed as (max_len, D) (squeeze of a unit dim, also a bitcast).
    x2 = x.reshape(S, B * D)
    pe2 = pe.reshape(max_len, D)
    s_tile = _pick_s_tile(S, bytes_per_row, budget, sublane,
                          need_mult8=True, min_steps=2)
    grid = (pl.cdiv(S, s_tile),)
    out2 = pl.pallas_call(
        _make_pe_add_flat_kernel(B, D),
        out_shape=jax.ShapeDtypeStruct((S, B * D), x.dtype),
        grid=grid,
        in_specs=[
            pl.BlockSpec((s_tile, B * D), lambda i: (i, 0)),
            pl.BlockSpec((s_tile, D), lambda i: (i, 0)),             # slices pe[:S]
        ],
        out_specs=pl.BlockSpec((s_tile, B * D), lambda i: (i, 0)),
        compiler_params=compiler_params,
        cost_estimate=cost,
    )(x2, pe2)
    return out2.reshape(S, B, D)


# ---------------------------------------------------------------------------
# Self-test
# ---------------------------------------------------------------------------
def _reference(x, pe):
    S = x.shape[0]
    return (x.astype(jnp.float32) + pe[:S]).astype(x.dtype)


def _check(out, ref, tag, atol):
    assert out.shape == ref.shape, f"{tag}: shape {out.shape} vs {ref.shape}"
    ok = jnp.allclose(out.astype(jnp.float32), ref.astype(jnp.float32), atol=atol)
    assert bool(ok), f"mismatch: {tag}"


if __name__ == "__main__":
    key = jax.random.PRNGKey(0)
    k1, k2, k3, k4, k5 = jax.random.split(key, 5)

    # Case 1: small unaligned D, small batch, f32 -> flattened path.
    pe1 = make_positional_encoding_table(32, 64)
    x1 = jax.random.normal(k1, (32, 2, 32), dtype=jnp.float32)
    r1 = _reference(x1, pe1)
    _check(jax.block_until_ready(positional_encoding_forward(x1, pe1)),
           r1, "flat f32 default grid", 1e-6)
    # Tiny budget -> s_tile=8 -> 4-step pipelined grid on the same data.
    _check(jax.block_until_ready(
        positional_encoding_forward(x1, pe1, block_budget_bytes=18_432)),
        r1, "flat f32 tiled grid", 1e-6)

    # Case 2: lane-aligned D, small batch (B < bf16 sublane pack) -> flattened path.
    pe2 = make_positional_encoding_table(128, 64)
    x2 = jax.random.normal(k2, (16, 8, 128), dtype=jnp.bfloat16)
    r2 = _reference(x2, pe2)
    _check(jax.block_until_ready(positional_encoding_forward(x2, pe2)),
           r2, "flat bf16 default grid", 1e-2)
    _check(jax.block_until_ready(
        positional_encoding_forward(x2, pe2, block_budget_bytes=80_000)),
        r2, "flat bf16 tiled grid", 1e-2)

    # Case 3: lane-aligned D with sublane-filling batch (f32, B >= 8) -> 3-D path.
    pe3 = make_positional_encoding_table(128, 64)
    x3 = jax.random.normal(k3, (16, 8, 128), dtype=jnp.float32)
    _check(jax.block_until_ready(positional_encoding_forward(x3, pe3)),
           _reference(x3, pe3), "3d f32", 1e-6)

    # Case 4: ragged sequence length (S=20 not a multiple of the tile) -> masked last tile.
    pe4 = make_positional_encoding_table(32, 64)
    x4 = jax.random.normal(k4, (20, 2, 32), dtype=jnp.float32)
    _check(jax.block_until_ready(positional_encoding_forward(x4, pe4)),
           _reference(x4, pe4), "flat ragged S", 1e-6)

    # Case 5: tiny sequence (S < 8) -> universal 3-D fallback, single block.
    pe5 = make_positional_encoding_table(32, 64)
    x5 = jax.random.normal(k5, (4, 2, 32), dtype=jnp.float32)
    _check(jax.block_until_ready(positional_encoding_forward(x5, pe5)),
           _reference(x5, pe5), "3d tiny S", 1e-6)

    print("KERNEL_OK")
</pallas_src>

<mosaic_0001>
module attributes {stable_mosaic.version = 11 : i64} {
  func.func @kernel(%arg0: i32, %arg1: memref<16x64xf32, #tpu.memory_space<vmem>>, %arg2: memref<16x32xf32, #tpu.memory_space<vmem>>, %arg3: memref<16x64xf32, #tpu.memory_space<vmem>>) attributes {dimension_semantics = [#tpu.dimension_semantics<parallel>], iteration_bounds = array<i64: 2>, scalar_prefetch = 0 : i64, scratch_operands = 0 : i64, tpu.core_type = #tpu.core_type<tc>, window_params = [{transform_indices = @transform_0, window_bounds = array<i64: 16, 64>}, {transform_indices = @transform_1, window_bounds = array<i64: 16, 32>}, {transform_indices = @transform_2, window_bounds = array<i64: 16, 64>}]} {
    %c0 = arith.constant 0 : index
    %c0_0 = arith.constant 0 : index
    %0 = vector.load %arg2[%c0, %c0_0] : memref<16x32xf32, #tpu.memory_space<vmem>>, vector<16x32xf32>
    %c0_1 = arith.constant 0 : index
    %c0_2 = arith.constant 0 : index
    %1 = vector.load %arg1[%c0_1, %c0_2] : memref<16x64xf32, #tpu.memory_space<vmem>>, vector<16x32xf32>
    %2 = arith.addf %1, %0 : vector<16x32xf32>
    %c0_3 = arith.constant 0 : index
    %c0_4 = arith.constant 0 : index
    %3 = vector.load %arg3[%c0_3, %c0_4] : memref<16x64xf32, #tpu.memory_space<vmem>>, vector<16x32xf32>
    tpu.vector_store %arg3[%c0_3, %c0_4], %2 {strides = array<i32>} : memref<16x64xf32, #tpu.memory_space<vmem>>, vector<16x32xf32>,
    %c0_5 = arith.constant 0 : index
    %c32 = arith.constant 32 : index
    %4 = vector.load %arg1[%c0_5, %c32] : memref<16x64xf32, #tpu.memory_space<vmem>>, vector<16x32xf32>
    %5 = arith.addf %4, %0 : vector<16x32xf32>
    %c0_6 = arith.constant 0 : index
    %c32_7 = arith.constant 32 : index
    %6 = vector.load %arg3[%c0_6, %c32_7] : memref<16x64xf32, #tpu.memory_space<vmem>>, vector<16x32xf32>
    tpu.vector_store %arg3[%c0_6, %c32_7], %5 {strides = array<i32>} : memref<16x64xf32, #tpu.memory_space<vmem>>, vector<16x32xf32>,
    return
  }
  func.func @transform_0(%arg0: i32) -> (i32, i32) {
    %c0_i32 = arith.constant 0 : i32
    %c0_i32_0 = arith.constant 0 : i32
    return %arg0, %c0_i32 : i32, i32
  }
  func.func @transform_1(%arg0: i32) -> (i32, i32) {
    %c0_i32 = arith.constant 0 : i32
    %c0_i32_0 = arith.constant 0 : i32
    return %arg0, %c0_i32 : i32, i32
  }
  func.func @transform_2(%arg0: i32) -> (i32, i32) {
    %c0_i32 = arith.constant 0 : i32
    %c0_i32_0 = arith.constant 0 : i32
    return %arg0, %c0_i32 : i32, i32
  }
}

</mosaic_0001>

<bundles_post_ra>
// kernel: tpu_custom_call.1
= control target key start
LH: loop header
LB: loop body
LE: loop exit
PB: predicated region body
PF: predicated region fallthrough
CT: control target
= control target key end

     0   :  { %7 = vsyncpa [#allocation3], 0  ;;  %s528_s0 = inlined_call_operand.vmem [shape: f32[32,64], index: 0, kind: input, shape index: {}]   ;;  %s529_s1 = inlined_call_operand.vmem [shape: f32[64,32], index: 1, kind: input, shape index: {}]   ;;  %s530_s2 = inlined_call_operand.hbm [shape: f32[32,64], index: 2, kind: output, shape index: {}]  }
   0x1   :  { %9 = vsyncpa [#allocation3 + $0x1], 0  ;;  %s419_s9 = smov 0   ;;  %s421_s10 = smov 0  }
   0x2   :  { %s423_s11 = smov 0   ;;  %s425_s12 = smov 0  }
   0x3 LB: > { %s440_s13 = sadd.s32 4294967295, %s398_s12   ;;  %s279_s14 = sadd.s32 4294967294, %s398_s12   ;;  %s398_s12 = sphi %s425_s12, %s536_s12   ;;  %s394_s11 = sphi %s423_s11, %s535_s11   ;;  %s390_s10 = sphi %s421_s10, %s534_s10   ;;  %s386_s9 = sphi %s419_s9, %s533_s9  }
   0x4   : > { %s444_s15 = sadd.s32 1, %s398_s12   ;;  %s74_s16 = sadd.s32 1, %s394_s11 }
   0x5   : > { %s71_s17 = ssub.s32 %s398_s12, %s444_s15  ;;  %p84_p0 = scmp.ne.s32.totalorder %s394_s11, %s390_s10 }
   0x6   : > { %p72_p1 = scmp.eq.s32.totalorder %s71_s17, 0  ;;  %p85_p2 = scmp.eq.s32.totalorder %s440_s13, 1 }
   0x7   : > { %p90_p3 = scmp.ne.s32.totalorder %s390_s10, %s386_s9  ;;  %p91_p4 = scmp.eq.s32.totalorder %s279_s14, 1 }
   0x8   : > { %s455_s18 = scalar_select %p72_p1, %s394_s11, %s74_s16  }
   0x9   : > { %p457_p5 = por %p85_p2, %p84_p0  ;;  %p461_p6 = por %p91_p4, %p90_p3 }
   0xa   : > { %p282_p7 = scmp.ge.s32.totalorder %s398_s12, 1  ;;  %p127_p8 = scmp.lt.s32.totalorder %s398_s12, 3 }
   0xc   : > { %p128_p9 = pnand %p282_p7, %p127_p8 }
   0xd   : > { %s284_s21 = sshll.u32 (!%p128_p9), %s440_s13, 1  ;;  %s151_s24 = sand.u32 (!%p128_p9), 1, %s390_s10   ;;  %vm173_vm0 = vcmask (!%p128_p9), 261120   ;;  %vm188_vm1 = vcmask (!%p128_p9), 523520  }
   0xe   : > { %131 = sbr.rel (%p128_p9) target bundleno = 162 (0xa2), region = 28  ;;  %p161_p10 = scmp.lt.s32.totalorder (!%p128_p9), %s284_s21, 7 }
   0xf   : > { %p155_p11 = scmp.lt.s32.totalorder (!%p128_p9), %s284_s21, 3  ;;  %s400_s28 = smov (!%p128_p9), 32  }
  0x10   : > { %s283_s29 = sshll.u32 (!%p128_p9), %s151_s24, 4  ;;  %s293_s7 = sshll.u32 (!%p128_p9), %s440_s13, 8 }
  0x11   : > { %s153_s6 = scalar_lea.vmem (!%p128_p9), [#allocation2], %s283_s29  ;;  %s481_s17 = scalar_lea.hbm (!%p128_p9), %s530_s2, %s293_s7 }
  0x12   : > { %s205_s8 = sshll.u32 (!%p128_p9), %s153_s6, 4  ;;  %s401_s13 = smov (!%p128_p9), [#allocation2]   ;;  %s483_s8 = int_to_ptr.vmem [resolvable:$true] %s205_s8 }
  0x15   : > { %s162_s22 = scalar_select %p161_p10, %s284_s21, 7 }
  0x16   : > { %s538_s21 = smov (!%p155_p11, %s284_s21), 3 }
  0x17   : > { %s287_s23 = sshll.u32 %s162_s22, 3  ;;  %s285_s30 = sshll.u32 %s538_s21, 3 }
  0x18   : > { %s164_s27 = scalar_lea.vmem %s529_s1, %s287_s23  ;;  %s158_s5 = scalar_lea.vmem %s528_s0, %s285_s30 }
  0x19   : > { %v167_v0 = vld [vmem:[%s164_s27] sm:$0xff]  ;;  %v168_v1 = vld [vmem:[%s164_s27 + $0x8] sm:$0xff]  ;;  %s487_s21 = scalar_lea.sflag [#allocation3], %s151_s24  ;;  %s336_s22 = scalar_lea.vmem %s483_s8, 256 }
  0x1a   : > { %180 = vrot.lane.b32.xlu0 %v167_v0, %s400_s28  ;;  %v169_v2 = vld [vmem:[%s158_s5] sm:$0xff]  ;;  %v170_v3 = vld [vmem:[%s158_s5 + $0x8] sm:$0xff]  ;;  %p337_p12 = scmp.ne.s32.totalorder %s483_s8, %s336_s22  ;;  %s340_s23 = sshll.u32 %s401_s13, 4  ;;  %s341_s23 = int_to_ptr.vmem [resolvable:$false] %s340_s23 }
  0x1b   : > { %v171_v4 = vadd.f32 %v169_v2, %v167_v0  ;;  %v172_v5 = vadd.f32 %v170_v3, %v168_v1  ;;  %s342_s25 = scalar_lea.vmem %s341_s23, 512  ;;  %p343_p1 = scmp.lt.s32.totalorder %s483_s8, %s341_s23 }
  0x1c   : > { %p338_p13 = pnand %p337_p12, %p457_p5  ;;  %p344_p2 = scmp.lt.s32.totalorder %s342_s25, %s336_s22 }
  0x1d   : > { %174 = vst.msk [vmem:[%s153_s6] sm:$0xff] %vm173_vm0, %v171_v4  ;;  %175 = vst.msk [vmem:[%s153_s6 + $0x8] sm:$0xff] %vm173_vm0, %v172_v5 }
  0x1e   : > { %182 = vrot.lane.b32.xlu0 %v168_v1, %s400_s28  ;;  %p339_p0 = pneg %p338_p13  ;;  %p345_p3 = por %p344_p2, %p343_p1 }
  0x20   : > { %p346_p4 = pnand %p345_p3, %p339_p0 }
  0x8c   : > { %v181_v6 = vpop.permute.xlu0 %180 }
  0x8d   : > { %v186_v7 = vadd.f32 %v181_v6, %v169_v2 }
  0x8f   : > { %189 = vst.msk [vmem:[%s153_s6] sm:$0xff] %vm188_vm1, %v186_v7 }
  0x90   : > { %v183_v8 = vpop.permute.xlu0 %182 }
  0x91   : > { %v187_v9 = vadd.f32 %v183_v8, %v170_v3 }
  0x93   : > { %190 = vst.msk [vmem:[%s153_s6 + $0x8] sm:$0xff] %vm188_vm1, %v187_v9 }
  0x94   : > { %349 = shalt.err (!%p346_p4)
}
  0x95   : > { %s350_s24 = scalar_lea.hbm %s481_s17, 256  ;;  %s354_s28 = scalar_lea.hbm %s530_s2, 512 }
  0x96   : > { %p351_p7 = scmp.ne.s32.totalorder %s481_s17, %s350_s24  ;;  %p355_p10 = scmp.lt.u32.totalorder %s481_s17, %s530_s2 }
  0x97   : > { %p356_p11 = scmp.lt.u32.totalorder %s354_s28, %s350_s24  ;;  %p358_p13 = scmp.lt.u32.totalorder %s350_s24, %s481_s17 }
  0x98   : > { %p352_p8 = pnand %p351_p7, %p457_p5 }
  0x99   : > { %p357_p12 = por %p356_p11, %p355_p10 }
  0x9a   : > { %p353_p9 = pneg %p352_p8 }
  0x9b   : > { %p359_p0 = por %p358_p13, %p357_p12 }
  0x9d   : > { %p360_p1 = pnand %p359_p0, %p353_p9 }
  0x9f   : > { %363 = shalt.err (!%p360_p1)
}
  0xa0   : > { %s402_s3 = smov 128   ;;  %s403_s4 = smov 8  }
  0xa1   : > { %294 = dma.vmem_to_hbm [thread:$0]  (%p457_p5), %s483_s8, 256, %s481_s17, %s487_s21, %s402_s3, %s402_s3, %s403_s4  }
  0xa2 PF: > { %p300_p2 = scmp.ge.s32.totalorder %s398_s12, 2  ;;  %s220_s5 = sand.u32 1, %s386_s9  }
  0xa3   : > { %s221_s6 = scalar_lea.sflag [#allocation3], %s220_s5 }
  0xa4   : > { %p297_p3 = pnand %p300_p2, %p461_p6 }
  0xa6   : > { %381 = dma.done.wait (!%p297_p3), %s221_s6, 256  }
  0xa7   : > { %383 = vsyncadd (!%p297_p3), %s221_s6, 4294967040  ;;  %p12_p4 = scmp.ge.s32.totalorder %s444_s15, 4   ;;  %s533_s9 = smov %s390_s10 }
  0xa8   : > { %s534_s10 = smov %s394_s11  ;;  %s535_s11 = smov %s455_s18 }
  0xa9   : > { %s536_s12 = smov %s444_s15  ;;  %14 = sbr.rel (!%p12_p4) target bundleno = 3 (0x3), region = 66 }
  0xb0   :  { %226 = vsyncpa [#allocation3], 1 }
  0xb1   :  { %228 = vsyncpa [#allocation3 + $0x1], 1 }

</bundles_post_ra>
